<compile_context>
chip_gen: v5e
topology: v5e:2x2
jax: 0.10.0
libtpu: 0.0.40
codegen_flags: <defaults>
</compile_context>

<pallas_src>
import jax
import jax.numpy as jnp
from jax.experimental import pallas as pl
from jax.experimental.pallas import tpu as pltpu

# ---- static problem sizes (small, TPU-tile friendly) -----------------------
B = 8            # batch
F = 32           # continuous_dim (feature width of each backbone input)
H1 = 64          # MLP hidden (true width)
H1P = 128        # MLP hidden zero-padded to full lane width
D1 = 128         # backbone-0 output dim
T2, D2 = 4, 128  # GATE-like: num_trees, per-tree output dim
L3, D3 = 4, 128  # NODE-like: num_layers, per-layer output dim

KIN = 3 * F                  # 96  : fused first-layer K
NIN = H1P + D2 + D3          # 384 : fused first-layer N  ([h1 | o2 | o3])
SLAB_R = 128                 # weight-slab rows (>= max(KIN, H1P))
SLAB_C = NIN + D1            # 512 : weight/bias slab columns
OUT_DIM = D1 + D2 + D3       # 384


def stacking_kernel(x_ref, w_ref, b_ref, out_ref):
    # Fused block-diagonal first layer: [h1 | o2 | o3] in one MXU pass.
    x = x_ref[...]                                   # (B, 96)
    w_in = w_ref[0:KIN, 0:NIN]                       # (96, 384)  tile-aligned slice
    b_in = b_ref[:, 0:NIN]                           # (1, 384)
    h = jnp.dot(x, w_in, preferred_element_type=jnp.float32) + b_in     # (B, 384)

    # Backbone 0 second layer (rows 64:128 of w1b are zero padding, so the
    # padded half of h1 contributes nothing).
    h1 = jnp.maximum(h[:, 0:H1P], 0.0)               # (B, 128)
    w1b = w_ref[:, NIN:SLAB_C]                       # (128, 128)
    b1b = b_ref[:, NIN:SLAB_C]                       # (1, 128)
    o1 = jnp.dot(h1, w1b, preferred_element_type=jnp.float32) + b1b     # (B, 128)

    # Backbones 1/2: tree/layer means already folded into the weights, their
    # outputs are h[:, 128:384].  torch.cat(outputs, dim=1) as one store.
    out_ref[...] = jnp.concatenate([o1, h[:, H1P:NIN]], axis=1).astype(out_ref.dtype)


def stacking_backbone_forward(x_list, packed):
    x = jnp.concatenate(x_list, axis=1)              # (B, 3F): one input DMA
    vmem = pl.BlockSpec(memory_space=pltpu.VMEM)     # tiny arrays -> whole-array blocks
    flops = 2 * B * KIN * NIN + 2 * B * H1P * D1
    bytes_accessed = 4 * (B * KIN + SLAB_R * SLAB_C + SLAB_C + B * OUT_DIM)
    return pl.pallas_call(
        stacking_kernel,
        out_shape=jax.ShapeDtypeStruct((B, OUT_DIM), jnp.float32),
        in_specs=[vmem, vmem, vmem],
        out_specs=vmem,
        cost_estimate=pl.CostEstimate(
            flops=flops, transcendentals=0, bytes_accessed=bytes_accessed),
    )(x, packed["w_slab"], packed["b_slab"])


def init_params(key):
    """Original (unfused) per-backbone parameters, as the PyTorch module holds."""
    ks = jax.random.split(key, 8)
    scale = 0.1
    return {
        "w1a": scale * jax.random.normal(ks[0], (F, H1), jnp.float32),
        "b1a": scale * jax.random.normal(ks[1], (1, H1), jnp.float32),
        "w1b": scale * jax.random.normal(ks[2], (H1, D1), jnp.float32),
        "b1b": scale * jax.random.normal(ks[3], (1, D1), jnp.float32),
        "w2": scale * jax.random.normal(ks[4], (F, T2 * D2), jnp.float32),
        "b2": scale * jax.random.normal(ks[5], (1, T2 * D2), jnp.float32),
        "w3": scale * jax.random.normal(ks[6], (F, L3 * D3), jnp.float32),
        "b3": scale * jax.random.normal(ks[7], (1, L3 * D3), jnp.float32),
    }


def pack_params(p):
    """One-time parameter transform (init-side algebra, not per-call work).

    Valid because backbones 1/2 are purely linear up to their mean reduction
    (true for this synthetic instantiation)."""
    # Fold tree / layer means into the weights.
    w2f = p["w2"].reshape(F, T2, D2).mean(axis=1)          # (F, 128)
    b2f = p["b2"].reshape(T2, D2).mean(axis=0)             # (128,)
    w3f = p["w3"].reshape(F, L3, D3).mean(axis=1)          # (F, 128)
    b3f = p["b3"].reshape(L3, D3).mean(axis=0)             # (128,)

    # Weight slab: [ block-diag W_in (96x384, zero-row padded) | W1b (128x128) ]
    w_slab = jnp.zeros((SLAB_R, SLAB_C), jnp.float32)
    w_slab = w_slab.at[0:F, 0:H1].set(p["w1a"])                      # backbone 0, layer 1
    w_slab = w_slab.at[F:2 * F, H1P:H1P + D2].set(w2f)               # backbone 1 (folded)
    w_slab = w_slab.at[2 * F:3 * F, H1P + D2:NIN].set(w3f)           # backbone 2 (folded)
    w_slab = w_slab.at[0:H1, NIN:SLAB_C].set(p["w1b"])               # backbone 0, layer 2

    # Bias slab: [ b1a(pad) | b2' | b3' | b1b ]
    b_slab = jnp.zeros((1, SLAB_C), jnp.float32)
    b_slab = b_slab.at[0, 0:H1].set(p["b1a"][0])
    b_slab = b_slab.at[0, H1P:H1P + D2].set(b2f)
    b_slab = b_slab.at[0, H1P + D2:NIN].set(b3f)
    b_slab = b_slab.at[0, NIN:SLAB_C].set(p["b1b"][0])
    return {"w_slab": w_slab, "b_slab": b_slab}


def reference_forward(x_list, p):
    """Pure-JAX reference mirroring the PyTorch StackingBackbone.forward (unfused)."""
    x1, x2, x3 = x_list
    # backbone 0 (2-D output, no reduction branch)
    o1 = jnp.maximum(x1 @ p["w1a"] + p["b1a"], 0.0) @ p["w1b"] + p["b1b"]
    # backbone 1 (GATE-like 3-D (B, D2, T2) -> mean over last dim)
    h2 = (x2 @ p["w2"] + p["b2"]).reshape(B, T2, D2).transpose(0, 2, 1)
    o2 = h2.mean(axis=-1)
    # backbone 2 (NODE-like 3-D (B, L3, D3) -> mean over dim 1)
    h3 = (x3 @ p["w3"] + p["b3"]).reshape(B, L3, D3)
    o3 = h3.mean(axis=1)
    return jnp.concatenate([o1, o2, o3], axis=1)


if __name__ == "__main__":
    key = jax.random.PRNGKey(0)
    k_p, k1, k2, k3 = jax.random.split(key, 4)
    params = init_params(k_p)
    packed = pack_params(params)          # one-time init transform
    x_list = [
        jax.random.normal(k1, (B, F), jnp.float32),
        jax.random.normal(k2, (B, F), jnp.float32),
        jax.random.normal(k3, (B, F), jnp.float32),
    ]

    out = stacking_backbone_forward(x_list, packed)
    out = jax.block_until_ready(out)

    ref = reference_forward(x_list, params)
    assert out.shape == (B, OUT_DIM)
    assert jnp.allclose(out, ref, atol=1e-4, rtol=1e-4)

    print("KERNEL_OK")
</pallas_src>

<mosaic_0001>
module attributes {stable_mosaic.version = 11 : i64} {
  func.func @stacking_kernel(%arg0: memref<8x96xf32, #tpu.memory_space<vmem>>, %arg1: memref<128x512xf32, #tpu.memory_space<vmem>>, %arg2: memref<1x512xf32, #tpu.memory_space<vmem>>, %arg3: memref<8x384xf32, #tpu.memory_space<vmem>>) attributes {dimension_semantics = [], scalar_prefetch = 0 : i64, scratch_operands = 0 : i64, tpu.core_type = #tpu.core_type<tc>} {
    %c0 = arith.constant 0 : index
    %c0_0 = arith.constant 0 : index
    %0 = vector.load %arg0[%c0, %c0_0] : memref<8x96xf32, #tpu.memory_space<vmem>>, vector<8x96xf32>
    %c0_1 = arith.constant 0 : index
    %c0_2 = arith.constant 0 : index
    %1 = vector.load %arg1[%c0_1, %c0_2] : memref<128x512xf32, #tpu.memory_space<vmem>>, vector<96x384xf32>
    %c0_3 = arith.constant 0 : index
    %c0_4 = arith.constant 0 : index
    %2 = vector.load %arg2[%c0_3, %c0_4] : memref<1x512xf32, #tpu.memory_space<vmem>>, vector<1x384xf32>
    %cst = arith.constant dense<0.000000e+00> : vector<8x384xf32>
    %3 = tpu.matmul %0, %1, %cst {dimension_numbers = #tpu.dot_dimension_numbers<[1], [0], [0], [1], [0, 0, 1, 1], [], []>} : vector<8x96xf32>, vector<96x384xf32>, vector<8x384xf32> -> vector<8x384xf32>
    %4 = vector.broadcast %2 : vector<1x384xf32> to vector<8x384xf32>
    %5 = arith.addf %3, %4 : vector<8x384xf32>
    %6 = vector.extract_strided_slice %5 {offsets = [0, 0], sizes = [8, 128], strides = [1, 1]} : vector<8x384xf32> to vector<8x128xf32>
    %cst_5 = arith.constant 0.000000e+00 : f32
    %7 = vector.broadcast %cst_5 : f32 to vector<8x128xf32>
    %8 = arith.maximumf %6, %7 : vector<8x128xf32>
    %c0_6 = arith.constant 0 : index
    %c384 = arith.constant 384 : index
    %9 = vector.load %arg1[%c0_6, %c384] : memref<128x512xf32, #tpu.memory_space<vmem>>, vector<128x128xf32>
    %c0_7 = arith.constant 0 : index
    %c384_8 = arith.constant 384 : index
    %10 = vector.load %arg2[%c0_7, %c384_8] : memref<1x512xf32, #tpu.memory_space<vmem>>, vector<1x128xf32>
    %cst_9 = arith.constant dense<0.000000e+00> : vector<8x128xf32>
    %11 = tpu.matmul %8, %9, %cst_9 {dimension_numbers = #tpu.dot_dimension_numbers<[1], [0], [0], [1], [0, 0, 1, 1], [], []>} : vector<8x128xf32>, vector<128x128xf32>, vector<8x128xf32> -> vector<8x128xf32>
    %12 = vector.broadcast %10 : vector<1x128xf32> to vector<8x128xf32>
    %13 = arith.addf %11, %12 : vector<8x128xf32>
    %14 = vector.extract_strided_slice %5 {offsets = [0, 128], sizes = [8, 256], strides = [1, 1]} : vector<8x384xf32> to vector<8x256xf32>
    %15 = tpu.concatenate %13, %14 in 1 : vector<8x128xf32>, vector<8x256xf32> -> vector<8x384xf32>
    %c0_10 = arith.constant 0 : index
    %c0_11 = arith.constant 0 : index
    %16 = vector.load %arg3[%c0_10, %c0_11] : memref<8x384xf32, #tpu.memory_space<vmem>>, vector<8x384xf32>
    tpu.vector_store %arg3[%c0_10, %c0_11], %15 {strides = array<i32>} : memref<8x384xf32, #tpu.memory_space<vmem>>, vector<8x384xf32>,
    return
  }
}

</mosaic_0001>

<bundles_post_ra>
// kernel: tpu_custom_call.1
= control target key start
LH: loop header
LB: loop body
LE: loop exit
PB: predicated region body
PF: predicated region fallthrough
CT: control target
= control target key end

     0   :  { %8 = vsyncpa [#allocation3], 0  ;;  %s382_s0 = inlined_call_operand.hbm [shape: f32[8,96], index: 0, kind: input, shape index: {}]   ;;  %s383_s1 = inlined_call_operand.hbm [shape: f32[128,512], index: 1, kind: input, shape index: {}]   ;;  %s384_s2 = inlined_call_operand.hbm [shape: f32[1,512], index: 2, kind: input, shape index: {}]   ;;  %s385_s3 = inlined_call_operand.hbm [shape: f32[8,384], index: 3, kind: output, shape index: {}]  }
   0x1   :  { %9 = vsyncpa [#allocation6], 0  ;;  %s26_s14 = sshll.u32 %s383_s1, 4  ;;  %s27_s14 = int_to_ptr.hbm [resolvable:$true] %s26_s14 }
   0x2   :  { %10 = vsyncpa [#allocation4], 0  ;;  %s341_s15 = smov [#allocation5]   ;;  %s16_s19 = sshll.u32 %s382_s0, 4  ;;  %s17_s19 = int_to_ptr.hbm [resolvable:$true] %s16_s19 }
   0x3   :  { %s28_s16 = sshll.u32 %s341_s15, 4  ;;  %s342_s20 = smov 512   ;;  %s29_s16 = int_to_ptr.vmem [resolvable:$true] %s28_s16 }
   0x4   :  { %s343_s21 = smov 32   ;;  %s344_s22 = smov [#allocation2]  }
   0x5   :  { %34 = dma.hbm_to_vmem [thread:$0]  %s27_s14, 8192, %s29_s16, [#allocation6], %s342_s20, %s342_s20, %s343_s21  }
   0x6   :  { %s18_s23 = sshll.u32 %s344_s22, 4  ;;  %s40_s26 = sshll.u32 %s384_s2, 4  ;;  %s19_s23 = int_to_ptr.vmem [resolvable:$true] %s18_s23  ;;  %s41_s26 = int_to_ptr.hbm [resolvable:$true] %s40_s26 }
   0x7   :  { %21 = dma.hbm_to_vmem [thread:$0]  %s17_s19, 128, %s19_s23, [#allocation3]  }
   0x8   :  { %s345_s1 = smov [#allocation7]  }
   0x9   :  { %s42_s27 = sshll.u32 %s345_s1, 4  ;;  %s43_s27 = int_to_ptr.vmem [resolvable:$true] %s42_s27 }
   0xa   :  { %45 = dma.hbm_to_vmem [thread:$0]  %s41_s26, 64, %s43_s27, [#allocation6]  }
   0xb   :  { %335 = dma.done.wait [#allocation3], 128  }
   0xc   :  { %336 = vsyncadd [#allocation3], 4294967168 }
   0xd   :  { %337 = dma.done.wait [#allocation6], 8256  }
   0xe   :  { %338 = vsyncadd [#allocation6], 4294959040  ;;  %v92_v0 = vld [vmem:[#allocation5 + $0x160] sm:$0xff]  ;;  %v183_v4 = vld [vmem:[#allocation5 + $0x1f8] sm:$0xff]  ;;  %vm103_vm0 = vcmask 785408   ;;  %s346_s0 = smov [#allocation8]  }
   0xf   :  { %v89_v1 = vld [vmem:[#allocation5 + $0x140] sm:$0xff]  ;;  %111 = vmatpush.msra.mxu0 %v92_v0  ;;  %v182_v5 = vld [vmem:[#allocation5 + $0x1d8] sm:$0xff]  ;;  %188 = vmatpush.msra.mxu3 %v183_v4  ;;  %v94_v6 = vld [vmem:[#allocation5 + $0x170] sm:$0xff]  ;;  %s216_s2 = sshll.u32 %s346_s0, 4  ;;  %s218_s30 = sshll.u32 %s385_s3, 4  ;;  %s217_s2 = int_to_ptr.vmem [resolvable:$true] %s216_s2  ;;  %s219_s30 = int_to_ptr.hbm [resolvable:$true] %s218_s30 }
  0x10   :  { %v86_v2 = vld [vmem:[#allocation5 + $0x120] sm:$0xff]  ;;  %v181_v8 = vld [vmem:[#allocation5 + $0x1b8] sm:$0xff]  ;;  %151 = vmatpush.msra.mxu2 %v94_v6  ;;  %v91_v9 = vld [vmem:[#allocation5 + $0x150] sm:$0xff] }
  0x11   :  { %112 = vmatpush.msra.mxu0 %v89_v1  ;;  %v83_v3 = vld [vmem:[#allocation5 + $0x100] sm:$0xff]  ;;  %189 = vmatpush.msra.mxu3 %v182_v5  ;;  %v88_v10 = vld [vmem:[#allocation5 + $0x130] sm:$0xff]  ;;  %v93_v11 = vld [vmem:[#allocation5 + $0x168] sm:$0xff] }
  0x12   :  { %v80_v7 = vld [vmem:[#allocation5 + $0xe0] sm:$0xff]  ;;  %v180_v13 = vld [vmem:[#allocation5 + $0x198] sm:$0xff]  ;;  %152 = vmatpush.msra.mxu2 %v91_v9  ;;  %131 = vmatpush.msra.mxu1 %v93_v11  ;;  %v90_v14 = vld [vmem:[#allocation5 + $0x148] sm:$0xff] }
  0x13   :  { %113 = vmatpush.msra.mxu0 %v86_v2  ;;  %v77_v12 = vld [vmem:[#allocation5 + $0xc0] sm:$0xff]  ;;  %190 = vmatpush.msra.mxu3 %v181_v8  ;;  %v85_v15 = vld [vmem:[#allocation5 + $0x110] sm:$0xff]  ;;  %v87_v16 = vld [vmem:[#allocation5 + $0x128] sm:$0xff] }
  0x14   :  { %v74_v17 = vld [vmem:[#allocation5 + $0xa0] sm:$0xff]  ;;  %v179_v18 = vld [vmem:[#allocation5 + $0x178] sm:$0xff]  ;;  %153 = vmatpush.msra.mxu2 %v88_v10  ;;  %132 = vmatpush.msra.mxu1 %v90_v14  ;;  %v82_v19 = vld [vmem:[#allocation5 + $0xf0] sm:$0xff] }
  0x15   :  { %114 = vmatpush.msra.mxu0 %v83_v3  ;;  %191 = vmatpush.msra.mxu3 %v180_v13  ;;  %v84_v20 = vld [vmem:[#allocation5 + $0x108] sm:$0xff]  ;;  %v71_v21 = vld [vmem:[#allocation5 + $0x80] sm:$0xff]  ;;  %v178_v22 = vld [vmem:[#allocation5 + $0x158] sm:$0xff] }
  0x16   :  { %154 = vmatpush.msra.mxu2 %v85_v15  ;;  %133 = vmatpush.msra.mxu1 %v87_v16  ;;  %v79_v23 = vld [vmem:[#allocation5 + $0xd0] sm:$0xff]  ;;  %v81_v24 = vld [vmem:[#allocation5 + $0xe8] sm:$0xff]  ;;  %v68_v25 = vld [vmem:[#allocation5 + $0x60] sm:$0xff] }
  0x17   :  { %115 = vmatpush.msra.mxu0 %v80_v7  ;;  %192 = vmatpush.msra.mxu3 %v179_v18  ;;  %v177_v26 = vld [vmem:[#allocation5 + $0x138] sm:$0xff]  ;;  %v76_v27 = vld [vmem:[#allocation5 + $0xb0] sm:$0xff]  ;;  %v78_v28 = vld [vmem:[#allocation5 + $0xc8] sm:$0xff] }
  0x18   :  { %155 = vmatpush.msra.mxu2 %v82_v19  ;;  %134 = vmatpush.msra.mxu1 %v84_v20  ;;  %v65_v29 = vld [vmem:[#allocation5 + $0x40] sm:$0xff]  ;;  %v176_v30 = vld [vmem:[#allocation5 + $0x118] sm:$0xff]  ;;  %v73_v31 = vld [vmem:[#allocation5 + $0x90] sm:$0xff] }
  0x19   :  { %116 = vmatpush.msra.mxu0 %v77_v12  ;;  %193 = vmatpush.msra.mxu3 %v178_v22  ;;  %v62_v32 = vld [vmem:[#allocation5 + $0x20] sm:$0xff]  ;;  %v175_v33 = vld [vmem:[#allocation5 + $0xf8] sm:$0xff]  ;;  %v70_v34 = vld [vmem:[#allocation5 + $0x70] sm:$0xff] }
  0x1a   :  { %156 = vmatpush.msra.mxu2 %v79_v23  ;;  %135 = vmatpush.msra.mxu1 %v81_v24  ;;  %v59_v35 = vld [vmem:[#allocation5] sm:$0xff]  ;;  %v174_v36 = vld [vmem:[#allocation5 + $0xd8] sm:$0xff]  ;;  %v75_v41 = vld [vmem:[#allocation5 + $0xa8] sm:$0xff] }
  0x1b   :  { %117 = vmatpush.msra.mxu0 %v74_v17  ;;  %194 = vmatpush.msra.mxu3 %v177_v26  ;;  %v58_v37 = vld [vmem:[#allocation2] sm:$0xff]  ;;  %v67_v42 = vld [vmem:[#allocation5 + $0x50] sm:$0xff]  ;;  %v72_v44 = vld [vmem:[#allocation5 + $0x88] sm:$0xff] }
  0x1c   :  { %157 = vmatpush.msra.mxu2 %v76_v27  ;;  %136 = vmatpush.msra.mxu1 %v78_v28  ;;  %v173_v38 = vld [vmem:[#allocation5 + $0xb8] sm:$0xff]  ;;  %v64_v45 = vld [vmem:[#allocation5 + $0x30] sm:$0xff]  ;;  %v69_v47 = vld [vmem:[#allocation5 + $0x68] sm:$0xff] }
  0x1d   :  { %118 = vmatpush.msra.mxu0 %v71_v21  ;;  %195 = vmatpush.msra.mxu3 %v176_v30  ;;  %v172_v39 = vld [vmem:[#allocation5 + $0x98] sm:$0xff]  ;;  %v61_v48 = vld [vmem:[#allocation5 + $0x10] sm:$0xff]  ;;  %v66_v50 = vld [vmem:[#allocation5 + $0x48] sm:$0xff] }
  0x1e   :  { %158 = vmatpush.msra.mxu2 %v73_v31  ;;  %v171_v40 = vld [vmem:[#allocation5 + $0x78] sm:$0xff]  ;;  %137 = vmatpush.msra.mxu1 %v75_v41  ;;  %v63_v51 = vld [vmem:[#allocation5 + $0x28] sm:$0xff]  ;;  %v95_v53 = vld [vmem:[#allocation7] sm:$0x7] }
  0x1f   :  { %119 = vmatpush.msra.mxu0 %v68_v25  ;;  %196 = vmatpush.msra.mxu3 %v175_v33  ;;  %v170_v43 = vld [vmem:[#allocation5 + $0x58] sm:$0xff]  ;;  %v60_v52 = vld [vmem:[#allocation5 + $0x8] sm:$0xff]  ;;  %v97_v54 = vperm.slane %v95_v53, 0  ;;  %v98_v58 = vperm.slane %v95_v53, 1  ;;  %v99_v59 = vperm.slane %v95_v53, 2 }
  0x20   :  { %159 = vmatpush.msra.mxu2 %v70_v34  ;;  %v169_v46 = vld [vmem:[#allocation5 + $0x38] sm:$0xff]  ;;  %138 = vmatpush.msra.mxu1 %v72_v44  ;;  %v238_v0 = vld [vmem:[#allocation7 + $0x3] ss:$0 sm:$0xff] }
  0x21   :  { %120 = vmatpush.msra.mxu0 %v65_v29  ;;  %197 = vmatpush.msra.mxu3 %v174_v36  ;;  %v168_v49 = vld [vmem:[#allocation5 + $0x18] sm:$0xff] }
  0x22   :  { %160 = vmatpush.msra.mxu2 %v67_v42  ;;  %139 = vmatpush.msra.mxu1 %v69_v47 }
  0x23   :  { %121 = vmatpush.msra.mxu0 %v62_v32  ;;  %198 = vmatpush.msra.mxu3 %v173_v38 }
  0x24   :  { %161 = vmatpush.msra.mxu2 %v64_v45  ;;  %140 = vmatpush.msra.mxu1 %v66_v50 }
  0x25   :  { %122 = vmatpush.msra.mxu0 %v59_v35  ;;  %199 = vmatpush.msra.mxu3 %v172_v39 }
  0x26   :  { %229 = vmatmul.msk.f32.vlgmr.msra.gmra.mxu0 %vm103_vm0, %v58_v37  ;;  %162 = vmatpush.msra.mxu2 %v61_v48 }
  0x27   :  { %200 = vmatpush.msra.mxu3 %v171_v40  ;;  %231 = vmatmul.msk.f32.vlgmr.msra.gmra.mxu2 %vm103_vm0, %v58_v37 }
  0x28   :  { %141 = vmatpush.msra.mxu1 %v63_v51 }
  0x29   :  { %201 = vmatpush.msra.mxu3 %v170_v43 }
  0x2a   :  { %142 = vmatpush.msra.mxu1 %v60_v52 }
  0x2b   :  { %202 = vmatpush.msra.mxu3 %v169_v46  ;;  %230 = vmatmul.msk.f32.vlgmr.msra.gmra.mxu1 %vm103_vm0, %v58_v37 }
  0x2d   :  { %203 = vmatpush.msra.mxu3 %v168_v49 }
  0xa3   :  { %v124_v55 = vpop.f32.mrf.mxu0 }
  0xa4   :  { %v125_v56 = vadd.f32 %v124_v55, %v97_v54 }
  0xa6   :  { %v167_v57 = vmax.f32 %v125_v56, 0.0 }
  0xa8   :  { %204 = vmatmul.f32.vlgmr.msra.gmra.mxu3 %v167_v57  ;;  %v144_v60 = vpop.f32.mrf.mxu1 }
  0xa9   :  { %v145_v62 = vadd.f32 %v144_v60, %v98_v58 }
  0xaa   :  { %v164_v61 = vpop.f32.mrf.mxu2 }
  0xab   :  { %v165_v63 = vadd.f32 %v164_v61, %v99_v59  ;;  %209 = vst [vmem:[#allocation8 + $0x8] sm:$0xff] %v145_v62 }
  0xad   :  { %210 = vst [vmem:[#allocation8 + $0x10] sm:$0xff] %v165_v63 }
 0x12b   :  { %v205_v1 = vpop.f32.mrf.mxu3 }
 0x12c   :  { %v206_v2 = vadd.f32 %v238_v0, %v205_v1 }
 0x12e   :  { %208 = vst [vmem:[#allocation8] sm:$0xff] %v206_v2 }
 0x12f   :  { %221 = dma.vmem_to_hbm [thread:$0]  %s217_s2, 384, %s219_s30, [#allocation4]  }
 0x130   :  { %339 = dma.done.wait [#allocation4], 384  }
 0x131   :  { %340 = vsyncadd [#allocation4], 4294966912 }
 0x132   :  { %226 = vsyncpa [#allocation3], 1 }
 0x133   :  { %227 = vsyncpa [#allocation6], 1 }
 0x134   :  { %228 = vsyncpa [#allocation4], 1 }

</bundles_post_ra>
